<compile_context>
chip_gen: v5e
topology: v5e:2x2
jax: 0.10.0
libtpu: 0.0.40
codegen_flags: <defaults>
</compile_context>

<pallas_src>
import functools

import jax
import jax.numpy as jnp
from jax.experimental import pallas as pl
from jax.experimental.pallas import tpu as pltpu

LANE = 128
SUBLANE = 8


def _round_up(n, m):
    return ((n + m - 1) // m) * m


def _vmem_capacity_bytes():
    try:
        return int(pltpu.get_tpu_info().vmem_capacity_bytes)
    except Exception:
        return 64 * 1024 * 1024  # conservative: v7x per-TensorCore VMEM


def _spec(shape, index_map, single_buffer=False):
    """BlockSpec helper; single_buffer=True requests Buffered(1) residents."""
    if single_buffer:
        try:
            return pl.BlockSpec(shape, index_map,
                                pipeline_mode=pl.Buffered(buffer_count=1))
        except TypeError:
            pass  # older API without pipeline_mode: fall back to default buffering
    return pl.BlockSpec(shape, index_map)


# ----------------------------- kernels -------------------------------------


def mlp_kernel(x_ref, w1_ref, b1_ref, w2_ref, b2_ref, w3_ref, b3_ref, o_ref):
    """Fully fused MLP for VMEM-resident weights (1-D batch grid)."""
    h1 = jnp.dot(x_ref[...], w1_ref[...], preferred_element_type=jnp.float32)
    h1 = jnp.maximum(h1 + b1_ref[...], 0.0)
    h2 = jnp.dot(h1.astype(w2_ref.dtype), w2_ref[...],
                 preferred_element_type=jnp.float32)
    h2 = jnp.maximum(h2 + b2_ref[...], 0.0)
    o = jnp.dot(h2.astype(w3_ref.dtype), w3_ref[...],
                preferred_element_type=jnp.float32)
    o_ref[...] = (o + b3_ref[...]).astype(o_ref.dtype)


def mlp_kernel_h1_tiled(x_ref, w1_ref, b1_ref, w2_ref, b2_ref, w3_ref, b3_ref,
                        o_ref, acc_ref):
    """Fallback: grid = (batch tiles, h1 tiles); fc2 pre-activation accumulated
    over h1 blocks in a VMEM scratch, fc3 applied at the last h1 block."""
    j = pl.program_id(1)

    @pl.when(j == 0)
    def _init():
        acc_ref[...] = jnp.zeros_like(acc_ref)

    h1 = jnp.dot(x_ref[...], w1_ref[...], preferred_element_type=jnp.float32)
    h1 = jnp.maximum(h1 + b1_ref[...], 0.0)
    acc_ref[...] += jnp.dot(h1.astype(w2_ref.dtype), w2_ref[...],
                            preferred_element_type=jnp.float32)

    @pl.when(j == pl.num_programs(1) - 1)
    def _finish():
        h2 = jnp.maximum(acc_ref[...] + b2_ref[...], 0.0)
        o = jnp.dot(h2.astype(w3_ref.dtype), w3_ref[...],
                    preferred_element_type=jnp.float32)
        o_ref[...] = (o + b3_ref[...]).astype(o_ref.dtype)


# ----------------------------- wrapper --------------------------------------


def prepare_mlp_params(w1, b1, w2, b2, w3, b3, param_dtype=None):
    """Zero-pad parameters to 128-lane multiples ONCE at init.

    wK: [fan_in, fan_out] (transposed vs. torch), bK: [1, fan_out].
    Zero padding is semantics-preserving (padded rows/cols and biases are 0,
    ReLU(0) = 0).  Optionally cast to bf16 (param_dtype=jnp.bfloat16)."""
    def pad2(a, rows, cols):
        dt = param_dtype or a.dtype
        return jnp.zeros((rows, cols), dt).at[: a.shape[0], : a.shape[1]].set(
            a.astype(dt))

    in_f, h1 = w1.shape
    h2 = w2.shape[1]
    out_f = w3.shape[1]
    in_p, h1_p, h2_p, out_p = (_round_up(d, LANE) for d in (in_f, h1, h2, out_f))
    return (pad2(w1, in_p, h1_p), pad2(b1, 1, h1_p),
            pad2(w2, h1_p, h2_p), pad2(b2, 1, h2_p),
            pad2(w3, h2_p, out_p), pad2(b3, 1, out_p))


@functools.partial(
    jax.jit,
    static_argnames=("out_features", "block_batch", "force_h1_tiling", "h1_block"))
def mlp_forward(x, w1p, b1p, w2p, b2p, w3p, b3p, *, out_features,
                block_batch=1024, force_h1_tiling=False, h1_block=None):
    """x: [B, in_features]; padded params from prepare_mlp_params()."""
    B, in_f = x.shape
    in_p, h1_p = w1p.shape
    h2_p = w2p.shape[1]
    out_p = w3p.shape[1]
    param_bytes = jnp.dtype(w1p.dtype).itemsize
    act_bytes = 4  # f32 intermediates / accumulator (conservative)

    vmem_cap = _vmem_capacity_bytes()
    budget = int(0.85 * vmem_cap)

    # --- batch tile: multiple of 8; ensure >= 2 grid steps when batch allows
    #     (v7x has 2 TensorCores to shard the "parallel" axis over) ---
    tb = block_batch
    if B > SUBLANE:
        tb = min(tb, _round_up(-(-B // 2), SUBLANE))
    tb = max(min(tb, _round_up(B, SUBLANE)), SUBLANE)

    # Single-buffered resident weight/bias footprint.
    weight_bytes = param_bytes * (
        in_p * h1_p + h1_p * h2_p + h2_p * out_p + h1_p + h2_p + out_p)
    use_h1_tiling = force_h1_tiling or (weight_bytes > int(0.6 * vmem_cap))

    if not use_h1_tiling:
        # ------------------ fully resident weights path ---------------------
        def vmem_needed(tb_):
            return (act_bytes * (2 * tb_ * (in_p + out_p)   # x/o tiles, 2x buffered
                                 + tb_ * (h1_p + h2_p))      # both live intermediates
                    + weight_bytes)                           # weights, 1x buffered

        while tb > SUBLANE and vmem_needed(tb) > budget:
            tb = max(_round_up(tb // 2, SUBLANE), SUBLANE)

        b_pad = _round_up(B, tb)
        n_tiles = b_pad // tb
        xp = jnp.zeros((b_pad, in_p), x.dtype).at[:B, :in_f].set(x)

        vmem_limit = int(min(max(vmem_needed(tb) * 5 // 4, 8 << 20),
                             int(0.9 * vmem_cap)))

        def resident(shape):
            return _spec(shape, lambda i: (0, 0), single_buffer=True)

        out_padded = pl.pallas_call(
            mlp_kernel,
            out_shape=jax.ShapeDtypeStruct((b_pad, out_p), x.dtype),
            grid=(n_tiles,),
            in_specs=[
                pl.BlockSpec((tb, in_p), lambda i: (i, 0)),
                resident((in_p, h1_p)), resident((1, h1_p)),
                resident((h1_p, h2_p)), resident((1, h2_p)),
                resident((h2_p, out_p)), resident((1, out_p)),
            ],
            out_specs=pl.BlockSpec((tb, out_p), lambda i: (i, 0)),
            compiler_params=pltpu.CompilerParams(
                dimension_semantics=("parallel",),
                vmem_limit_bytes=vmem_limit,
            ),
        )(xp, w1p, b1p, w2p, b2p, w3p, b3p)
    else:
        # ------------------ h1-tiled (large weights) path --------------------
        def vmem_needed(tb_, th1_):
            per_step = param_bytes * 2 * (in_p * th1_ + th1_ * h2_p + th1_)  # w1/b1/w2 blocks
            pinned_w = param_bytes * (h2_p * out_p + h2_p + out_p)           # w3/b2/b3
            acts = act_bytes * (2 * tb_ * (in_p + out_p) + tb_ * (th1_ + 2 * h2_p))
            return per_step + pinned_w + acts

        if h1_block is not None:
            assert h1_p % h1_block == 0, "h1_block must evenly divide padded h1"
            th1 = h1_block
        else:
            n_lane_blocks = h1_p // LANE
            th1 = h1_p
            for d in range(1, n_lane_blocks + 1):   # prefer fewest h1 tiles that fit
                if n_lane_blocks % d == 0:
                    th1 = h1_p // d
                    if vmem_needed(tb, th1) <= budget:
                        break
        while tb > SUBLANE and vmem_needed(tb, th1) > budget:
            tb = max(_round_up(tb // 2, SUBLANE), SUBLANE)

        b_pad = _round_up(B, tb)
        n_tiles = b_pad // tb
        n_h1 = h1_p // th1
        xp = jnp.zeros((b_pad, in_p), x.dtype).at[:B, :in_f].set(x)

        vmem_limit = int(min(max(vmem_needed(tb, th1) * 5 // 4, 8 << 20),
                             int(0.9 * vmem_cap)))

        def pinned(shape):
            return _spec(shape, lambda i, j: (0, 0), single_buffer=True)

        out_padded = pl.pallas_call(
            mlp_kernel_h1_tiled,
            out_shape=jax.ShapeDtypeStruct((b_pad, out_p), x.dtype),
            grid=(n_tiles, n_h1),
            in_specs=[
                pl.BlockSpec((tb, in_p), lambda i, j: (i, 0)),
                pl.BlockSpec((in_p, th1), lambda i, j: (0, j)),
                pl.BlockSpec((1, th1), lambda i, j: (0, j)),
                pl.BlockSpec((th1, h2_p), lambda i, j: (j, 0)),
                pinned((1, h2_p)),
                pinned((h2_p, out_p)),
                pinned((1, out_p)),
            ],
            out_specs=pl.BlockSpec((tb, out_p), lambda i, j: (i, 0)),
            scratch_shapes=[pltpu.VMEM((tb, h2_p), jnp.float32)],
            compiler_params=pltpu.CompilerParams(
                dimension_semantics=("parallel", "arbitrary"),
                vmem_limit_bytes=vmem_limit,
            ),
        )(xp, w1p, b1p, w2p, b2p, w3p, b3p)

    return out_padded[:B, :out_features]


def init_linear(key, fan_in, fan_out):
    """Mimic torch.nn.Linear default init: U(-1/sqrt(fan_in), 1/sqrt(fan_in))."""
    kw, kb = jax.random.split(key)
    bound = 1.0 / jnp.sqrt(fan_in)
    # stored as [fan_in, fan_out] (transposed vs. PyTorch's [out, in])
    w = jax.random.uniform(kw, (fan_in, fan_out), jnp.float32, -bound, bound)
    b = jax.random.uniform(kb, (1, fan_out), jnp.float32, -bound, bound)
    return w, b


def _ref_mlp(x, w1, b1, w2, b2, w3, b3):
    h = jnp.maximum(x @ w1 + b1, 0.0)
    h = jnp.maximum(h @ w2 + b2, 0.0)
    return h @ w3 + b3


if __name__ == "__main__":
    # --- Test 1: module's shapes (fully resident path) ---
    in_features, h1, h2, out_features = 4, 8, 9, 3
    batch = 8

    key = jax.random.PRNGKey(0)
    kx, k1, k2, k3 = jax.random.split(key, 4)

    x = jax.random.normal(kx, (batch, in_features), jnp.float32)
    w1, b1 = init_linear(k1, in_features, h1)
    w2, b2 = init_linear(k2, h1, h2)
    w3, b3 = init_linear(k3, h2, out_features)

    params = prepare_mlp_params(w1, b1, w2, b2, w3, b3)  # pad ONCE at init
    out = mlp_forward(x, *params, out_features=out_features)
    out = jax.block_until_ready(out)

    ref = _ref_mlp(x, w1, b1, w2, b2, w3, b3)
    assert out.shape == (batch, out_features)
    assert jnp.allclose(out, ref, atol=1e-5), "mismatch vs reference (resident path)"

    # --- Test 2: exercise the large-weight fallback (h1-tiled accumulation)
    #     at small shapes by forcing the path and a 128-wide h1 block. ---
    in2, h1b, h2b, out2, batch2 = 4, 200, 9, 3, 20
    xb = jax.random.normal(kx, (batch2, in2), jnp.float32)
    w1b, b1b = init_linear(k1, in2, h1b)
    w2b, b2b = init_linear(k2, h1b, h2b)
    w3b, b3b = init_linear(k3, h2b, out2)

    params_b = prepare_mlp_params(w1b, b1b, w2b, b2b, w3b, b3b)
    out_b = mlp_forward(xb, *params_b, out_features=out2,
                        force_h1_tiling=True, h1_block=128)
    out_b = jax.block_until_ready(out_b)

    ref_b = _ref_mlp(xb, w1b, b1b, w2b, b2b, w3b, b3b)
    assert out_b.shape == (batch2, out2)
    assert jnp.allclose(out_b, ref_b, atol=1e-5), "mismatch vs reference (h1-tiled path)"

    print("KERNEL_OK")
</pallas_src>

<mosaic_0001>
module attributes {stable_mosaic.version = 11 : i64} {
  func.func @mlp_kernel(%arg0: i32, %arg1: memref<8x128xf32, #tpu.memory_space<vmem>>, %arg2: memref<128x128xf32, #tpu.memory_space<vmem>>, %arg3: memref<1x128xf32, #tpu.memory_space<vmem>>, %arg4: memref<128x128xf32, #tpu.memory_space<vmem>>, %arg5: memref<1x128xf32, #tpu.memory_space<vmem>>, %arg6: memref<128x128xf32, #tpu.memory_space<vmem>>, %arg7: memref<1x128xf32, #tpu.memory_space<vmem>>, %arg8: memref<8x128xf32, #tpu.memory_space<vmem>>) attributes {dimension_semantics = [#tpu.dimension_semantics<parallel>], iteration_bounds = array<i64: 1>, scalar_prefetch = 0 : i64, scratch_operands = 0 : i64, tpu.core_type = #tpu.core_type<tc>, window_params = [{transform_indices = @transform_0, window_bounds = array<i64: 8, 128>}, {pipeline_mode = #tpu.pipeline_mode<synchronous>, transform_indices = @transform_1, window_bounds = array<i64: 128, 128>}, {pipeline_mode = #tpu.pipeline_mode<synchronous>, transform_indices = @transform_2, window_bounds = array<i64: 1, 128>}, {pipeline_mode = #tpu.pipeline_mode<synchronous>, transform_indices = @transform_3, window_bounds = array<i64: 128, 128>}, {pipeline_mode = #tpu.pipeline_mode<synchronous>, transform_indices = @transform_4, window_bounds = array<i64: 1, 128>}, {pipeline_mode = #tpu.pipeline_mode<synchronous>, transform_indices = @transform_5, window_bounds = array<i64: 128, 128>}, {pipeline_mode = #tpu.pipeline_mode<synchronous>, transform_indices = @transform_6, window_bounds = array<i64: 1, 128>}, {transform_indices = @transform_7, window_bounds = array<i64: 8, 128>}]} {
    %c0 = arith.constant 0 : index
    %c0_0 = arith.constant 0 : index
    %0 = vector.load %arg1[%c0, %c0_0] : memref<8x128xf32, #tpu.memory_space<vmem>>, vector<8x128xf32>
    %c0_1 = arith.constant 0 : index
    %c0_2 = arith.constant 0 : index
    %1 = vector.load %arg2[%c0_1, %c0_2] : memref<128x128xf32, #tpu.memory_space<vmem>>, vector<128x128xf32>
    %cst = arith.constant dense<0.000000e+00> : vector<8x128xf32>
    %2 = tpu.matmul %0, %1, %cst {dimension_numbers = #tpu.dot_dimension_numbers<[1], [0], [0], [1], [0, 0, 1, 1], [], []>} : vector<8x128xf32>, vector<128x128xf32>, vector<8x128xf32> -> vector<8x128xf32>
    %c0_3 = arith.constant 0 : index
    %c0_4 = arith.constant 0 : index
    %3 = vector.load %arg3[%c0_3, %c0_4] : memref<1x128xf32, #tpu.memory_space<vmem>>, vector<1x128xf32>
    %4 = vector.broadcast %3 : vector<1x128xf32> to vector<8x128xf32>
    %5 = arith.addf %2, %4 : vector<8x128xf32>
    %cst_5 = arith.constant 0.000000e+00 : f32
    %6 = vector.broadcast %cst_5 : f32 to vector<8x128xf32>
    %7 = arith.maximumf %5, %6 : vector<8x128xf32>
    %c0_6 = arith.constant 0 : index
    %c0_7 = arith.constant 0 : index
    %8 = vector.load %arg4[%c0_6, %c0_7] : memref<128x128xf32, #tpu.memory_space<vmem>>, vector<128x128xf32>
    %cst_8 = arith.constant dense<0.000000e+00> : vector<8x128xf32>
    %9 = tpu.matmul %7, %8, %cst_8 {dimension_numbers = #tpu.dot_dimension_numbers<[1], [0], [0], [1], [0, 0, 1, 1], [], []>} : vector<8x128xf32>, vector<128x128xf32>, vector<8x128xf32> -> vector<8x128xf32>
    %c0_9 = arith.constant 0 : index
    %c0_10 = arith.constant 0 : index
    %10 = vector.load %arg5[%c0_9, %c0_10] : memref<1x128xf32, #tpu.memory_space<vmem>>, vector<1x128xf32>
    %11 = vector.broadcast %10 : vector<1x128xf32> to vector<8x128xf32>
    %12 = arith.addf %9, %11 : vector<8x128xf32>
    %cst_11 = arith.constant 0.000000e+00 : f32
    %13 = vector.broadcast %cst_11 : f32 to vector<8x128xf32>
    %14 = arith.maximumf %12, %13 : vector<8x128xf32>
    %c0_12 = arith.constant 0 : index
    %c0_13 = arith.constant 0 : index
    %15 = vector.load %arg6[%c0_12, %c0_13] : memref<128x128xf32, #tpu.memory_space<vmem>>, vector<128x128xf32>
    %cst_14 = arith.constant dense<0.000000e+00> : vector<8x128xf32>
    %16 = tpu.matmul %14, %15, %cst_14 {dimension_numbers = #tpu.dot_dimension_numbers<[1], [0], [0], [1], [0, 0, 1, 1], [], []>} : vector<8x128xf32>, vector<128x128xf32>, vector<8x128xf32> -> vector<8x128xf32>
    %c0_15 = arith.constant 0 : index
    %c0_16 = arith.constant 0 : index
    %17 = vector.load %arg7[%c0_15, %c0_16] : memref<1x128xf32, #tpu.memory_space<vmem>>, vector<1x128xf32>
    %18 = vector.broadcast %17 : vector<1x128xf32> to vector<8x128xf32>
    %19 = arith.addf %16, %18 : vector<8x128xf32>
    %c0_17 = arith.constant 0 : index
    %c0_18 = arith.constant 0 : index
    %20 = vector.load %arg8[%c0_17, %c0_18] : memref<8x128xf32, #tpu.memory_space<vmem>>, vector<8x128xf32>
    tpu.vector_store %arg8[%c0_17, %c0_18], %19 {strides = array<i32>} : memref<8x128xf32, #tpu.memory_space<vmem>>, vector<8x128xf32>,
    return
  }
  func.func @transform_0(%arg0: i32) -> (i32, i32) {
    %c0_i32 = arith.constant 0 : i32
    %c0_i32_0 = arith.constant 0 : i32
    return %arg0, %c0_i32 : i32, i32
  }
  func.func @transform_1(%arg0: i32) -> (i32, i32) {
    %c0_i32 = arith.constant 0 : i32
    %c0_i32_0 = arith.constant 0 : i32
    %c0_i32_1 = arith.constant 0 : i32
    return %c0_i32, %c0_i32_0 : i32, i32
  }
  func.func @transform_2(%arg0: i32) -> (i32, i32) {
    %c0_i32 = arith.constant 0 : i32
    %c0_i32_0 = arith.constant 0 : i32
    %c0_i32_1 = arith.constant 0 : i32
    return %c0_i32, %c0_i32_0 : i32, i32
  }
  func.func @transform_3(%arg0: i32) -> (i32, i32) {
    %c0_i32 = arith.constant 0 : i32
    %c0_i32_0 = arith.constant 0 : i32
    %c0_i32_1 = arith.constant 0 : i32
    return %c0_i32, %c0_i32_0 : i32, i32
  }
  func.func @transform_4(%arg0: i32) -> (i32, i32) {
    %c0_i32 = arith.constant 0 : i32
    %c0_i32_0 = arith.constant 0 : i32
    %c0_i32_1 = arith.constant 0 : i32
    return %c0_i32, %c0_i32_0 : i32, i32
  }
  func.func @transform_5(%arg0: i32) -> (i32, i32) {
    %c0_i32 = arith.constant 0 : i32
    %c0_i32_0 = arith.constant 0 : i32
    %c0_i32_1 = arith.constant 0 : i32
    return %c0_i32, %c0_i32_0 : i32, i32
  }
  func.func @transform_6(%arg0: i32) -> (i32, i32) {
    %c0_i32 = arith.constant 0 : i32
    %c0_i32_0 = arith.constant 0 : i32
    %c0_i32_1 = arith.constant 0 : i32
    return %c0_i32, %c0_i32_0 : i32, i32
  }
  func.func @transform_7(%arg0: i32) -> (i32, i32) {
    %c0_i32 = arith.constant 0 : i32
    %c0_i32_0 = arith.constant 0 : i32
    return %arg0, %c0_i32 : i32, i32
  }
}

</mosaic_0001>

<bundles_post_ra>
// kernel: mlp_forward.1
= control target key start
LH: loop header
LB: loop body
LE: loop exit
PB: predicated region body
PF: predicated region fallthrough
CT: control target
= control target key end

     0   :  { %12 = vsyncpa [#allocation3], 0  ;;  %s356_s0 = inlined_call_operand.vmem [shape: f32[8,128], index: 0, kind: input, shape index: {}]   ;;  %s357_s1 = inlined_call_operand.hbm [shape: f32[128,128], index: 1, kind: input, shape index: {}]   ;;  %s358_s2 = inlined_call_operand.vmem [shape: f32[1,128], index: 2, kind: input, shape index: {}]   ;;  %s359_s3 = inlined_call_operand.hbm [shape: f32[128,128], index: 3, kind: input, shape index: {}]   ;;  %s360_s4 = inlined_call_operand.vmem [shape: f32[1,128], index: 4, kind: input, shape index: {}]   ;;  %s361_s5 = inlined_call_operand.hbm [shape: f32[128,128], index: 5, kind: input, shape index: {}]   ;;  %s362_s6 = inlined_call_operand.vmem [shape: f32[1,128], index: 6, kind: input, shape index: {}]   ;;  %s363_s7 = inlined_call_operand.vmem [shape: f32[8,128], index: 7, kind: output, shape index: {}]  }
   0x1   :  { %13 = vsyncpa [#allocation5], 0  ;;  %s35_s26 = sshll.u32 %s359_s3, 4  ;;  %s287_s27 = smov [#allocation4]   ;;  %s36_s26 = int_to_ptr.hbm [resolvable:$true] %s35_s26 }
   0x2   :  { %s37_s28 = sshll.u32 %s287_s27, 4  ;;  %s20_s8 = sshll.u32 %s357_s1, 4  ;;  %s38_s28 = int_to_ptr.vmem [resolvable:$true] %s37_s28  ;;  %s21_s8 = int_to_ptr.hbm [resolvable:$true] %s20_s8 }
   0x3   :  { %s288_s9 = smov 128   ;;  %s289_s10 = smov 8  }
   0x4   :  { %43 = dma.hbm_to_vmem [thread:$0]  %s36_s26, 2048, %s38_s28, [#allocation5], %s288_s9, %s288_s9, %s289_s10  }
   0x5   :  { %s290_s11 = smov [#allocation2]   ;;  %s50_s15 = sshll.u32 %s361_s5, 4  ;;  %s51_s15 = int_to_ptr.hbm [resolvable:$true] %s50_s15 }
   0x6   :  { %s22_s12 = sshll.u32 %s290_s11, 4  ;;  %s291_s3 = smov [#allocation6]   ;;  %s23_s12 = int_to_ptr.vmem [resolvable:$true] %s22_s12 }
   0x7   :  { %28 = dma.hbm_to_vmem [thread:$0]  %s21_s8, 2048, %s23_s12, [#allocation3], %s288_s9, %s288_s9, %s289_s10  }
   0x8   :  { %s52_s16 = sshll.u32 %s291_s3, 4  ;;  %s53_s16 = int_to_ptr.vmem [resolvable:$true] %s52_s16 }
   0x9   :  { %58 = dma.hbm_to_vmem [thread:$0]  %s51_s15, 2048, %s53_s16, [#allocation5], %s288_s9, %s288_s9, %s289_s10  }
   0xa   :  { %283 = dma.done.wait [#allocation3], 2048  }
   0xb   :  { %284 = vsyncadd [#allocation3], 4294965248 }
   0xc   :  { %285 = dma.done.wait [#allocation5], 4096  }
   0xd   :  { %286 = vsyncadd [#allocation5], 4294963200  ;;  %v89_v0 = vld [vmem:[#allocation2 + $0x78] sm:$0xff]  ;;  %v88_v1 = vld [vmem:[#allocation2 + $0x70] sm:$0xff] }
   0xe   :  { %94 = vmatpush.msra.mxu0 %v89_v0  ;;  %v87_v2 = vld [vmem:[#allocation2 + $0x68] sm:$0xff]  ;;  %v86_v3 = vld [vmem:[#allocation2 + $0x60] sm:$0xff]  ;;  %v130_v4 = vld [vmem:[#allocation4 + $0x78] sm:$0xff] }
   0xf   :  { %v85_v5 = vld [vmem:[#allocation2 + $0x58] sm:$0xff]  ;;  %135 = vmatpush.msra.mxu1 %v130_v4  ;;  %v129_v6 = vld [vmem:[#allocation4 + $0x70] sm:$0xff]  ;;  %v128_v7 = vld [vmem:[#allocation4 + $0x68] sm:$0xff] }
  0x10   :  { %95 = vmatpush.msra.mxu0 %v88_v1  ;;  %v84_v8 = vld [vmem:[#allocation2 + $0x50] sm:$0xff]  ;;  %v127_v9 = vld [vmem:[#allocation4 + $0x60] sm:$0xff]  ;;  %v83_v10 = vld [vmem:[#allocation2 + $0x48] sm:$0xff] }
  0x11   :  { %136 = vmatpush.msra.mxu1 %v129_v6  ;;  %v126_v11 = vld [vmem:[#allocation4 + $0x58] sm:$0xff]  ;;  %v82_v12 = vld [vmem:[#allocation2 + $0x40] sm:$0xff]  ;;  %v125_v13 = vld [vmem:[#allocation4 + $0x50] sm:$0xff] }
  0x12   :  { %96 = vmatpush.msra.mxu0 %v87_v2  ;;  %v81_v14 = vld [vmem:[#allocation2 + $0x38] sm:$0xff]  ;;  %v124_v15 = vld [vmem:[#allocation4 + $0x48] sm:$0xff]  ;;  %v80_v16 = vld [vmem:[#allocation2 + $0x30] sm:$0xff] }
  0x13   :  { %137 = vmatpush.msra.mxu1 %v128_v7  ;;  %v123_v17 = vld [vmem:[#allocation4 + $0x40] sm:$0xff]  ;;  %v79_v18 = vld [vmem:[#allocation2 + $0x28] sm:$0xff]  ;;  %v122_v19 = vld [vmem:[#allocation4 + $0x38] sm:$0xff] }
  0x14   :  { %97 = vmatpush.msra.mxu0 %v86_v3  ;;  %v78_v20 = vld [vmem:[#allocation2 + $0x20] sm:$0xff]  ;;  %v121_v21 = vld [vmem:[#allocation4 + $0x30] sm:$0xff]  ;;  %v77_v22 = vld [vmem:[#allocation2 + $0x18] sm:$0xff] }
  0x15   :  { %138 = vmatpush.msra.mxu1 %v127_v9  ;;  %v120_v23 = vld [vmem:[#allocation4 + $0x28] sm:$0xff]  ;;  %v76_v24 = vld [vmem:[#allocation2 + $0x10] sm:$0xff]  ;;  %v119_v25 = vld [vmem:[#allocation4 + $0x20] sm:$0xff] }
  0x16   :  { %98 = vmatpush.msra.mxu0 %v85_v5  ;;  %v75_v26 = vld [vmem:[#allocation2 + $0x8] sm:$0xff]  ;;  %v118_v27 = vld [vmem:[#allocation4 + $0x18] sm:$0xff]  ;;  %v74_v28 = vld [vmem:[#allocation2] sm:$0xff] }
  0x17   :  { %139 = vmatpush.msra.mxu1 %v126_v11  ;;  %v73_v29 = vld [vmem:[%s356_s0] sm:$0xff]  ;;  %v117_v30 = vld [vmem:[#allocation4 + $0x10] sm:$0xff]  ;;  %v116_v31 = vld [vmem:[#allocation4 + $0x8] sm:$0xff] }
  0x18   :  { %99 = vmatpush.msra.mxu0 %v84_v8  ;;  %v115_v32 = vld [vmem:[#allocation4] sm:$0xff]  ;;  %v171_v33 = vld [vmem:[#allocation6 + $0x78] sm:$0xff]  ;;  %v170_v34 = vld [vmem:[#allocation6 + $0x70] sm:$0xff] }
  0x19   :  { %140 = vmatpush.msra.mxu1 %v125_v13  ;;  %176 = vmatpush.msra.mxu2 %v171_v33  ;;  %v169_v35 = vld [vmem:[#allocation6 + $0x68] sm:$0xff]  ;;  %v168_v36 = vld [vmem:[#allocation6 + $0x60] sm:$0xff]  ;;  %v167_v37 = vld [vmem:[#allocation6 + $0x58] sm:$0xff] }
  0x1a   :  { %100 = vmatpush.msra.mxu0 %v83_v10  ;;  %v166_v38 = vld [vmem:[#allocation6 + $0x50] sm:$0xff]  ;;  %v165_v39 = vld [vmem:[#allocation6 + $0x48] sm:$0xff]  ;;  %v164_v40 = vld [vmem:[#allocation6 + $0x40] sm:$0xff] }
  0x1b   :  { %141 = vmatpush.msra.mxu1 %v124_v15  ;;  %177 = vmatpush.msra.mxu2 %v170_v34  ;;  %v163_v41 = vld [vmem:[#allocation6 + $0x38] sm:$0xff]  ;;  %v162_v42 = vld [vmem:[#allocation6 + $0x30] sm:$0xff]  ;;  %v161_v43 = vld [vmem:[#allocation6 + $0x28] sm:$0xff] }
  0x1c   :  { %101 = vmatpush.msra.mxu0 %v82_v12  ;;  %v160_v44 = vld [vmem:[#allocation6 + $0x20] sm:$0xff]  ;;  %v159_v45 = vld [vmem:[#allocation6 + $0x18] sm:$0xff]  ;;  %v158_v50 = vld [vmem:[#allocation6 + $0x10] sm:$0xff] }
  0x1d   :  { %142 = vmatpush.msra.mxu1 %v123_v17  ;;  %178 = vmatpush.msra.mxu2 %v169_v35  ;;  %v208_v46 = vld [vmem:[%s358_s2] ss:$0 sm:$0xff]  ;;  %v157_v51 = vld [vmem:[#allocation6 + $0x8] sm:$0xff] }
  0x1e   :  { %102 = vmatpush.msra.mxu0 %v81_v14  ;;  %v156_v52 = vld [vmem:[#allocation6] sm:$0xff] }
  0x1f   :  { %143 = vmatpush.msra.mxu1 %v122_v19  ;;  %179 = vmatpush.msra.mxu2 %v168_v36  ;;  %v209_v53 = vld [vmem:[%s360_s4] ss:$0 sm:$0xff] }
  0x20   :  { %103 = vmatpush.msra.mxu0 %v80_v16  ;;  %v210_v57 = vld [vmem:[%s362_s6] ss:$0 sm:$0xff] }
  0x21   :  { %144 = vmatpush.msra.mxu1 %v121_v21  ;;  %180 = vmatpush.msra.mxu2 %v167_v37 }
  0x22   :  { %104 = vmatpush.msra.mxu0 %v79_v18 }
  0x23   :  { %145 = vmatpush.msra.mxu1 %v120_v23  ;;  %181 = vmatpush.msra.mxu2 %v166_v38 }
  0x24   :  { %105 = vmatpush.msra.mxu0 %v78_v20 }
  0x25   :  { %146 = vmatpush.msra.mxu1 %v119_v25  ;;  %182 = vmatpush.msra.mxu2 %v165_v39 }
  0x26   :  { %106 = vmatpush.msra.mxu0 %v77_v22 }
  0x27   :  { %147 = vmatpush.msra.mxu1 %v118_v27  ;;  %183 = vmatpush.msra.mxu2 %v164_v40 }
  0x28   :  { %107 = vmatpush.msra.mxu0 %v76_v24 }
  0x29   :  { %148 = vmatpush.msra.mxu1 %v117_v30  ;;  %184 = vmatpush.msra.mxu2 %v163_v41 }
  0x2a   :  { %108 = vmatpush.msra.mxu0 %v75_v26 }
  0x2b   :  { %149 = vmatpush.msra.mxu1 %v116_v31  ;;  %185 = vmatpush.msra.mxu2 %v162_v42 }
  0x2c   :  { %109 = vmatpush.msra.mxu0 %v74_v28 }
  0x2d   :  { %110 = vmatmul.f32.vlgmr.msra.gmra.mxu0 %v73_v29  ;;  %150 = vmatpush.msra.mxu1 %v115_v32 }
  0x2e   :  { %186 = vmatpush.msra.mxu2 %v161_v43 }
  0x30   :  { %187 = vmatpush.msra.mxu2 %v160_v44 }
  0x32   :  { %188 = vmatpush.msra.mxu2 %v159_v45 }
  0x34   :  { %189 = vmatpush.msra.mxu2 %v158_v50 }
  0x36   :  { %190 = vmatpush.msra.mxu2 %v157_v51 }
  0x38   :  { %191 = vmatpush.msra.mxu2 %v156_v52 }
  0xaa   :  { %v111_v47 = vpop.f32.mrf.mxu0 }
  0xab   :  { %v112_v48 = vadd.f32 %v208_v46, %v111_v47 }
  0xad   :  { %v114_v49 = vmax.f32 %v112_v48, 0.0 }
  0xaf   :  { %151 = vmatmul.f32.vlgmr.msra.gmra.mxu1 %v114_v49 }
 0x12c   :  { %v152_v54 = vpop.f32.mrf.mxu1 }
 0x12d   :  { %v153_v55 = vadd.f32 %v209_v53, %v152_v54 }
 0x12f   :  { %v155_v56 = vmax.f32 %v153_v55, 0.0 }
 0x131   :  { %192 = vmatmul.f32.vlgmr.msra.gmra.mxu2 %v155_v56 }
 0x1b4   :  { %v193_v58 = vpop.f32.mrf.mxu2 }
 0x1b5   :  { %v194_v59 = vadd.f32 %v210_v57, %v193_v58 }
 0x1b7   :  { %196 = vst [vmem:[%s363_s7] sm:$0xff] %v194_v59 }
 0x1b8   :  { %201 = vsyncpa [#allocation3], 1 }
 0x1b9   :  { %202 = vsyncpa [#allocation5], 1 }

</bundles_post_ra>
